<compile_context>
chip_gen: v7x
topology: tpu7x:2x2x1
jax: 0.10.0
libtpu: 0.0.40
codegen_flags: <defaults>
</compile_context>

<pallas_src>
import functools

import jax
import jax.numpy as jnp
from jax import lax
from jax.experimental import pallas as pl
from jax.experimental.pallas import tpu as pltpu


# ----------------------------- helpers ---------------------------------------

def _round_up(x, m):
    return (x + m - 1) // m * m


def _halo(k, d):
    """Lane-aligned causal-history width for a dilated conv of receptive P=(k-1)*d."""
    p = (k - 1) * d
    return 0 if p == 0 else _round_up(p, 128)


def _group_vmem_bytes(group, tl, in_bytes, out_bytes):
    """Estimated VMEM working set of one fused group at time tile `tl`."""
    c_in0 = group[0]["w1"].shape[2]
    c_out_last = group[-1]["w1"].shape[1]
    est = 2 * c_in0 * tl * in_bytes          # double-buffered input blocks
    est += 2 * c_out_last * tl * out_bytes   # double-buffered output blocks
    for p in group:
        k, c_out, c_in = p["w1"].shape
        f = _halo(k, p["dilation"])
        est += (c_in + c_out) * (f + tl) * 2                     # bf16 scratches
        w = k * c_out * (c_in + c_out) * 2 + 2 * c_out * 4       # conv weights+bias
        if p["w_down"] is not None:
            w += c_out * c_in * 2 + c_out * 4
        est += 2 * w                                             # double-buffered weights
    return est


def _pick_time_tile(L, group, in_bytes, out_bytes, budget, tl_cap=None):
    """Largest lane-aligned time tile whose working set fits `budget` bytes.
    L is padded up to a multiple of the chosen tile (lane-dense stores)."""
    lp = _round_up(L, 128)
    cands = {t for t in (2048, 1024, 512, 256, 128) if t <= lp and lp % t == 0}
    if lp <= 4096:
        cands.add(lp)                       # exact padded length as a single tile
    if tl_cap is not None:
        cands = {t for t in cands if t <= tl_cap} or {128}
    for tl in sorted(cands, reverse=True):
        if _group_vmem_bytes(group, tl, in_bytes, out_bytes) <= budget:
            return tl, _round_up(L, tl)
    return 128, _round_up(L, 128)


def _pack_groups(blocks, scratch_budget):
    """Greedily fuse consecutive blocks while the per-group scratch stays bounded."""
    groups, cur, cur_b = [], [], 0
    for p in blocks:
        k, c_out, c_in = p["w1"].shape
        f = _halo(k, p["dilation"])
        b = (c_in + c_out) * (f + 128) * 2
        if cur and cur_b + b > scratch_budget:
            groups.append(cur)
            cur, cur_b = [], 0
        cur.append(p)
        cur_b += b
    if cur:
        groups.append(cur)
    return groups


# ----------------------------- fused block-chain kernel ----------------------

def _fused_blocks_kernel(*refs, metas, multi_tile):
    """Chain of TemporalBlocks on one (batch, time-tile) grid cell.

    Refs, in order:
      x_ref                         (C_in0, TL)   current input time tile
      per block: w1 (k,Co,Ci), b1 (Co,1) f32, w2 (k,Co,Co), b2 (Co,1) f32,
                 [w_down (Co,Ci), b_down (Co,1) f32]
      o_ref                         (C_out_last, TL)
      per block: xbuf (Ci, F+TL) bf16, hbuf (Co, F+TL) bf16   (VMEM scratch)
    metas: tuple of (k, d, has_down) per block.  F = halo width (mult of 128 or 0).
    """
    n_w = sum(6 if hd else 4 for (_, _, hd) in metas)
    x_ref = refs[0]
    w_refs = refs[1:1 + n_w]
    o_ref = refs[1 + n_w]
    scratch = refs[2 + n_w:]

    ti = pl.program_id(1)
    TL = o_ref.shape[-1]

    # Start of a new batch element: zero ONLY the causal-halo columns (the
    # [F:F+TL) region is overwritten below).  Realizes Conv1d padding + Chomp1d.
    halo_widths = [scratch[2 * bi].shape[-1] - TL for bi in range(len(metas))]
    if any(f > 0 for f in halo_widths):
        @pl.when(ti == 0)
        def _():
            for bi, f in enumerate(halo_widths):
                if f > 0:
                    xb, hb = scratch[2 * bi], scratch[2 * bi + 1]
                    xb[:, 0:f] = jnp.zeros((xb.shape[0], f), xb.dtype)
                    hb[:, 0:f] = jnp.zeros((hb.shape[0], f), hb.dtype)

    cur = x_ref[...].astype(jnp.bfloat16)     # f32 network input cast in-kernel
    out_f = None
    wi = 0
    for bi, (k, d, has_down) in enumerate(metas):
        xbuf = scratch[2 * bi]
        hbuf = scratch[2 * bi + 1]
        F = halo_widths[bi]
        w1, b1, w2, b2 = w_refs[wi:wi + 4]
        wi += 4
        if has_down:
            wd, bd = w_refs[wi:wi + 2]
            wi += 2

        xbuf[:, F:F + TL] = cur               # lane-aligned staging of block input

        def causal_conv_relu(buf, w_ref, b_ref, F=F, k=k, d=d):
            # out[:, t] = relu(b + sum_j W[j] @ in[:, t - (k-1-j)*d]), zeros before start.
            c_out = w_ref.shape[1]
            acc = jnp.zeros((c_out, TL), jnp.float32)
            for j in range(k):                # static unroll over taps
                s = (k - 1 - j) * d           # causal back-shift of tap j
                acc = acc + jnp.dot(w_ref[j], buf[:, F - s:F - s + TL],
                                    preferred_element_type=jnp.float32)
            return jnp.maximum(acc + b_ref[...], 0.0)

        h1 = causal_conv_relu(xbuf, w1, b1)   # dropout1: identity in eval mode
        hbuf[:, F:F + TL] = h1.astype(hbuf.dtype)
        h2 = causal_conv_relu(hbuf, w2, b2)   # dropout2: identity in eval mode

        if has_down:                          # 1x1-conv residual branch
            res = jnp.dot(wd[...], cur, preferred_element_type=jnp.float32) + bd[...]
        else:                                 # identity residual
            res = cur.astype(jnp.float32)

        out_f = jnp.maximum(h2 + res, 0.0)    # f32 block output

        # Carry the most recent F steps into the halo for the next time tile.
        # Load-before-store: the RHS is materialized as a value before the store,
        # so this is correct even when F > TL (overlapping regions).
        if multi_tile and F > 0:
            x_tail = xbuf[:, TL:TL + F]
            h_tail = hbuf[:, TL:TL + F]
            xbuf[:, 0:F] = x_tail
            hbuf[:, 0:F] = h_tail

        cur = out_f.astype(jnp.bfloat16)      # next block's input (stays in VMEM)

    o_ref[...] = out_f.astype(o_ref.dtype)    # f32 for the last group, bf16 otherwise


# ----------------------------- pallas_call wrapper ---------------------------

def temporal_block_group(x, group, *, out_dtype, tl_cap=None, vmem_budget=20 << 20):
    """Fused chain of TemporalBlocks.  x: (B, C_in0, L) -> (B, C_out_last, L)."""
    B, C_in0, L = x.shape
    in_bytes = jnp.dtype(x.dtype).itemsize
    out_bytes = jnp.dtype(out_dtype).itemsize
    TL, Lp = _pick_time_tile(L, group, in_bytes, out_bytes, vmem_budget, tl_cap)
    n_t = Lp // TL
    if Lp != L:                               # pad time axis -> lane-dense stores
        x = jnp.pad(x, ((0, 0), (0, 0), (0, Lp - L)))

    metas = []
    in_specs = [pl.BlockSpec((None, C_in0, TL), lambda b, t: (b, 0, t))]
    args = [x]
    scratch = []
    for p in group:
        k, c_out, c_in = p["w1"].shape
        d = p["dilation"]
        F = _halo(k, d)
        has_down = p["w_down"] is not None
        metas.append((k, d, has_down))
        in_specs += [
            pl.BlockSpec((k, c_out, c_in), lambda b, t: (0, 0, 0)),
            pl.BlockSpec((c_out, 1), lambda b, t: (0, 0)),
            pl.BlockSpec((k, c_out, c_out), lambda b, t: (0, 0, 0)),
            pl.BlockSpec((c_out, 1), lambda b, t: (0, 0)),
        ]
        args += [p["w1"], p["b1"], p["w2"], p["b2"]]
        if has_down:
            in_specs += [pl.BlockSpec((c_out, c_in), lambda b, t: (0, 0)),
                         pl.BlockSpec((c_out, 1), lambda b, t: (0, 0))]
            args += [p["w_down"], p["b_down"]]
        scratch += [pltpu.VMEM((c_in, F + TL), jnp.bfloat16),
                    pltpu.VMEM((c_out, F + TL), jnp.bfloat16)]

    C_out_last = group[-1]["w1"].shape[1]
    est = _group_vmem_bytes(group, TL, in_bytes, out_bytes)
    # >= the 32 MiB scoped default of v6e/v7x (never below), capped well under
    # v7x's 64 MiB physical VMEM; v5e's 16 MiB default is always raised.
    vmem_limit = int(min(max(est * 3 // 2 + (4 << 20), 32 << 20), 48 << 20))

    kernel = functools.partial(_fused_blocks_kernel,
                               metas=tuple(metas), multi_tile=n_t > 1)
    out = pl.pallas_call(
        kernel,
        out_shape=jax.ShapeDtypeStruct((B, C_out_last, Lp), out_dtype),
        grid=(B, n_t),
        in_specs=in_specs,
        out_specs=pl.BlockSpec((None, C_out_last, TL), lambda b, t: (b, 0, t)),
        scratch_shapes=scratch,
        # batch is megacore-parallel; time must stay sequential ("arbitrary")
        # because the causal halo is carried across time tiles in VMEM.
        compiler_params=pltpu.CompilerParams(
            dimension_semantics=("parallel", "arbitrary"),
            vmem_limit_bytes=vmem_limit),
    )(*args)
    if Lp != L:
        out = out[:, :, :L]
    return out


# ----------------------------- model glue (plain JAX) ------------------------

def temporal_conv_net(x_ncl, blocks, *, tl_cap=None, scratch_budget=12 << 20):
    """Full TCN forward.  x_ncl: (B, C, L) f32 (PyTorch NCL) -> (B, C_out, L) f32.

    Blocks are fused into groups (usually the whole network); only the input,
    the output and rare group boundaries touch HBM."""
    groups = _pack_groups(blocks, scratch_budget)
    h = x_ncl
    for gi, g in enumerate(groups):
        last = gi == len(groups) - 1
        h = temporal_block_group(h, g,
                                 out_dtype=jnp.float32 if last else jnp.bfloat16,
                                 tl_cap=tl_cap)
    return h


def init_tcn_params(key, num_inputs, num_channels, kernel_size):
    """Kaiming-style init; weight_norm is an identity re-param at init (folded)."""
    blocks = []
    in_ch = num_inputs
    for i, out_ch in enumerate(num_channels):
        d = 2 ** i
        key, k1, k2, k3, k4, k5, k6 = jax.random.split(key, 7)
        std_conv = (2.0 / (out_ch * kernel_size)) ** 0.5   # kaiming fan_out, relu
        p = {
            "dilation": d,
            # stored as (k, C_out, C_in): tap-major, matmul-ready (C_out, C_in) slabs
            "w1": (jax.random.normal(k1, (kernel_size, out_ch, in_ch), jnp.float32)
                   * std_conv).astype(jnp.bfloat16),
            "b1": jax.random.normal(k2, (out_ch, 1), jnp.float32) * 0.1,
            "w2": (jax.random.normal(k3, (kernel_size, out_ch, out_ch), jnp.float32)
                   * std_conv).astype(jnp.bfloat16),
            "b2": jax.random.normal(k4, (out_ch, 1), jnp.float32) * 0.1,
            "w_down": None,
            "b_down": None,
        }
        if in_ch != out_ch:
            p["w_down"] = (jax.random.normal(k5, (out_ch, in_ch), jnp.float32)
                           * (2.0 / out_ch) ** 0.5).astype(jnp.bfloat16)
            p["b_down"] = jax.random.normal(k6, (out_ch, 1), jnp.float32) * 0.1
        blocks.append(p)
        in_ch = out_ch
    return blocks, key


# ----------------------------- pure-JAX reference ----------------------------

def tcn_reference(x_ncl, blocks):
    """lax.conv reference mirroring the kernel's bf16 rounding points.
    Intermediate block outputs are bf16; the final block output stays f32."""
    h = x_ncl.astype(jnp.bfloat16)
    nb = len(blocks)
    y = None
    for i, p in enumerate(blocks):
        d = p["dilation"]
        k = p["w1"].shape[0]
        pad = (k - 1) * d
        hf = h.astype(jnp.float32)

        def conv(z, w_koi, b):
            w = jnp.transpose(w_koi, (1, 2, 0)).astype(jnp.float32)  # (C_out, C_in, k)
            yy = lax.conv_general_dilated(
                z, w, window_strides=(1,), padding=[(pad, pad)],
                rhs_dilation=(d,), dimension_numbers=("NCH", "OIH", "NCH"))
            yy = yy[:, :, :z.shape[2]]                                # Chomp1d
            return yy + b.reshape(1, -1, 1)

        out = jnp.maximum(conv(hf, p["w1"], p["b1"]), 0.0)
        out = out.astype(jnp.bfloat16).astype(jnp.float32)            # kernel keeps h1 in bf16
        out = jnp.maximum(conv(out, p["w2"], p["b2"]), 0.0)
        if p["w_down"] is not None:
            res = (jnp.einsum("oc,bcl->bol", p["w_down"].astype(jnp.float32), hf)
                   + p["b_down"].reshape(1, -1, 1))
        else:
            res = hf
        y = jnp.maximum(out + res, 0.0)
        if i < nb - 1:
            h = y.astype(jnp.bfloat16)
    return y


# ----------------------------- main ------------------------------------------

def _check(out, ref, name):
    err = float(jnp.max(jnp.abs(out - ref)))
    assert jnp.allclose(out, ref, atol=5e-2, rtol=5e-2), (name, err)


if __name__ == "__main__":
    KSIZE = 3

    # --- small shapes implied by the module; whole network fused into one call ---
    key = jax.random.PRNGKey(0)
    B, C_IN, L = 2, 4, 16
    NUM_CHANNELS = [8, 8]      # block0: 4->8 (downsample residual), block1: 8->8 (identity)
    blocks, key = init_tcn_params(key, C_IN, NUM_CHANNELS, KSIZE)
    x = jax.random.normal(key, (B, C_IN, L), jnp.float32)   # PyTorch NCL input, f32
    out = jax.block_until_ready(temporal_conv_net(x, blocks))
    assert out.shape == (B, NUM_CHANNELS[-1], L), out.shape
    assert out.dtype == jnp.float32
    _check(out, tcn_reference(x, blocks), "small")

    # --- larger L: force TL=128 (3 tiles) to exercise the cross-tile causal carry
    #     with dilations 1, 2, 4, all three blocks fused in one kernel ---
    key2 = jax.random.PRNGKey(1)
    B2, C2, L2 = 2, 4, 384
    CH2 = [8, 16, 16]
    blocks2, key2 = init_tcn_params(key2, C2, CH2, KSIZE)
    x2 = jax.random.normal(key2, (B2, C2, L2), jnp.float32)
    ref2 = tcn_reference(x2, blocks2)
    out2 = jax.block_until_ready(temporal_conv_net(x2, blocks2, tl_cap=128))
    assert out2.shape == (B2, CH2[-1], L2), out2.shape
    _check(out2, ref2, "tiled-carry")

    # --- default tile selection (single lane-dense tile), still fully fused ---
    out3 = jax.block_until_ready(temporal_conv_net(x2, blocks2))
    _check(out3, ref2, "fused-default")

    # --- tiny scratch budget forces one block per group: exercises the f32-in /
    #     bf16-intermediate / f32-out group-boundary path ---
    out4 = jax.block_until_ready(temporal_conv_net(x2, blocks2, scratch_budget=1))
    _check(out4, ref2, "split-groups")

    print("KERNEL_OK")
</pallas_src>

<mosaic_0001>
module attributes {stable_mosaic.version = 11 : i64} {
  func.func @_fused_blocks_kernel(%arg0: i32, %arg1: i32, %arg2: memref<1x4x128xf32, #tpu.memory_space<vmem>>, %arg3: memref<3x8x4xbf16, #tpu.memory_space<vmem>>, %arg4: memref<8x1xf32, #tpu.memory_space<vmem>>, %arg5: memref<3x8x8xbf16, #tpu.memory_space<vmem>>, %arg6: memref<8x1xf32, #tpu.memory_space<vmem>>, %arg7: memref<8x4xbf16, #tpu.memory_space<vmem>>, %arg8: memref<8x1xf32, #tpu.memory_space<vmem>>, %arg9: memref<3x8x8xbf16, #tpu.memory_space<vmem>>, %arg10: memref<8x1xf32, #tpu.memory_space<vmem>>, %arg11: memref<3x8x8xbf16, #tpu.memory_space<vmem>>, %arg12: memref<8x1xf32, #tpu.memory_space<vmem>>, %arg13: memref<1x8x128xf32, #tpu.memory_space<vmem>>, %arg14: memref<4x256xbf16, #tpu.memory_space<vmem>>, %arg15: memref<8x256xbf16, #tpu.memory_space<vmem>>, %arg16: memref<8x256xbf16, #tpu.memory_space<vmem>>, %arg17: memref<8x256xbf16, #tpu.memory_space<vmem>>) attributes {dimension_semantics = [#tpu.dimension_semantics<parallel>, #tpu.dimension_semantics<arbitrary>], iteration_bounds = array<i64: 2, 1>, scalar_prefetch = 0 : i64, scratch_operands = 4 : i64, tpu.core_type = #tpu.core_type<tc>, window_params = [{transform_indices = @transform_0, window_bounds = array<i64: 1, 4, 128>}, {pipeline_mode = #tpu.pipeline_mode<synchronous>, transform_indices = @transform_1, window_bounds = array<i64: 3, 8, 4>}, {pipeline_mode = #tpu.pipeline_mode<synchronous>, transform_indices = @transform_2, window_bounds = array<i64: 8, 1>}, {pipeline_mode = #tpu.pipeline_mode<synchronous>, transform_indices = @transform_3, window_bounds = array<i64: 3, 8, 8>}, {pipeline_mode = #tpu.pipeline_mode<synchronous>, transform_indices = @transform_4, window_bounds = array<i64: 8, 1>}, {pipeline_mode = #tpu.pipeline_mode<synchronous>, transform_indices = @transform_5, window_bounds = array<i64: 8, 4>}, {pipeline_mode = #tpu.pipeline_mode<synchronous>, transform_indices = @transform_6, window_bounds = array<i64: 8, 1>}, {pipeline_mode = #tpu.pipeline_mode<synchronous>, transform_indices = @transform_7, window_bounds = array<i64: 3, 8, 8>}, {pipeline_mode = #tpu.pipeline_mode<synchronous>, transform_indices = @transform_8, window_bounds = array<i64: 8, 1>}, {pipeline_mode = #tpu.pipeline_mode<synchronous>, transform_indices = @transform_9, window_bounds = array<i64: 3, 8, 8>}, {pipeline_mode = #tpu.pipeline_mode<synchronous>, transform_indices = @transform_10, window_bounds = array<i64: 8, 1>}, {transform_indices = @transform_11, window_bounds = array<i64: 1, 8, 128>}]} {
    %c0_i32 = arith.constant 0 : i32
    %0 = arith.cmpi eq, %arg1, %c0_i32 : i32
    %1 = arith.extui %0 : i1 to i32
    %c0_i32_0 = arith.constant 0 : i32
    %2 = arith.cmpi ne, %1, %c0_i32_0 : i32
    scf.if %2 {
      %cst_102 = arith.constant 0.000000e+00 : bf16
      %112 = vector.broadcast %cst_102 : bf16 to vector<4x128xbf16>
      %c0_103 = arith.constant 0 : index
      %c0_104 = arith.constant 0 : index
      %113 = vector.load %arg14[%c0_103, %c0_104] : memref<4x256xbf16, #tpu.memory_space<vmem>>, vector<4x128xbf16>
      tpu.vector_store %arg14[%c0_103, %c0_104], %112 {strides = array<i32>} : memref<4x256xbf16, #tpu.memory_space<vmem>>, vector<4x128xbf16>,
      %cst_105 = arith.constant 0.000000e+00 : bf16
      %114 = vector.broadcast %cst_105 : bf16 to vector<8x128xbf16>
      %c0_106 = arith.constant 0 : index
      %c0_107 = arith.constant 0 : index
      %115 = vector.load %arg15[%c0_106, %c0_107] : memref<8x256xbf16, #tpu.memory_space<vmem>>, vector<8x128xbf16>
      tpu.vector_store %arg15[%c0_106, %c0_107], %114 {strides = array<i32>} : memref<8x256xbf16, #tpu.memory_space<vmem>>, vector<8x128xbf16>,
      %cst_108 = arith.constant 0.000000e+00 : bf16
      %116 = vector.broadcast %cst_108 : bf16 to vector<8x128xbf16>
      %c0_109 = arith.constant 0 : index
      %c0_110 = arith.constant 0 : index
      %117 = vector.load %arg16[%c0_109, %c0_110] : memref<8x256xbf16, #tpu.memory_space<vmem>>, vector<8x128xbf16>
      tpu.vector_store %arg16[%c0_109, %c0_110], %116 {strides = array<i32>} : memref<8x256xbf16, #tpu.memory_space<vmem>>, vector<8x128xbf16>,
      %cst_111 = arith.constant 0.000000e+00 : bf16
      %118 = vector.broadcast %cst_111 : bf16 to vector<8x128xbf16>
      %c0_112 = arith.constant 0 : index
      %c0_113 = arith.constant 0 : index
      %119 = vector.load %arg17[%c0_112, %c0_113] : memref<8x256xbf16, #tpu.memory_space<vmem>>, vector<8x128xbf16>
      tpu.vector_store %arg17[%c0_112, %c0_113], %118 {strides = array<i32>} : memref<8x256xbf16, #tpu.memory_space<vmem>>, vector<8x128xbf16>,
    } else {
    }
    %c0 = arith.constant 0 : index
    %c0_1 = arith.constant 0 : index
    %c0_2 = arith.constant 0 : index
    %3 = vector.load %arg2[%c0, %c0_1, %c0_2] : memref<1x4x128xf32, #tpu.memory_space<vmem>>, vector<1x4x128xf32>
    %4 = vector.shape_cast %3 : vector<1x4x128xf32> to vector<4x128xf32>
    %5 = arith.truncf %4 : vector<4x128xf32> to vector<4x128xbf16>
    %c0_3 = arith.constant 0 : index
    %c128 = arith.constant 128 : index
    %6 = vector.load %arg14[%c0_3, %c128] : memref<4x256xbf16, #tpu.memory_space<vmem>>, vector<4x128xbf16>
    tpu.vector_store %arg14[%c0_3, %c128], %5 {strides = array<i32>} : memref<4x256xbf16, #tpu.memory_space<vmem>>, vector<4x128xbf16>,
    %cst = arith.constant 0.000000e+00 : f32
    %7 = vector.broadcast %cst : f32 to vector<8x128xf32>
    %c0_4 = arith.constant 0 : index
    %c0_5 = arith.constant 0 : index
    %c0_6 = arith.constant 0 : index
    %8 = vector.load %arg3[%c0_4, %c0_5, %c0_6] : memref<3x8x4xbf16, #tpu.memory_space<vmem>>, vector<1x8x4xbf16>
    %9 = vector.shape_cast %8 : vector<1x8x4xbf16> to vector<8x4xbf16>
    %c0_7 = arith.constant 0 : index
    %c126 = arith.constant 126 : index
    %10 = vector.load %arg14[%c0_7, %c126] : memref<4x256xbf16, #tpu.memory_space<vmem>>, vector<4x128xbf16>
    %cst_8 = arith.constant dense<0.000000e+00> : vector<8x128xf32>
    %11 = tpu.matmul %9, %10, %cst_8 {dimension_numbers = #tpu.dot_dimension_numbers<[1], [0], [0], [1], [0, 0, 1, 1], [], []>} : vector<8x4xbf16>, vector<4x128xbf16>, vector<8x128xf32> -> vector<8x128xf32>
    %12 = arith.addf %7, %11 : vector<8x128xf32>
    %c1 = arith.constant 1 : index
    %c0_9 = arith.constant 0 : index
    %c0_10 = arith.constant 0 : index
    %13 = vector.load %arg3[%c1, %c0_9, %c0_10] : memref<3x8x4xbf16, #tpu.memory_space<vmem>>, vector<1x8x4xbf16>
    %14 = vector.shape_cast %13 : vector<1x8x4xbf16> to vector<8x4xbf16>
    %c0_11 = arith.constant 0 : index
    %c127 = arith.constant 127 : index
    %15 = vector.load %arg14[%c0_11, %c127] : memref<4x256xbf16, #tpu.memory_space<vmem>>, vector<4x128xbf16>
    %cst_12 = arith.constant dense<0.000000e+00> : vector<8x128xf32>
    %16 = tpu.matmul %14, %15, %cst_12 {dimension_numbers = #tpu.dot_dimension_numbers<[1], [0], [0], [1], [0, 0, 1, 1], [], []>} : vector<8x4xbf16>, vector<4x128xbf16>, vector<8x128xf32> -> vector<8x128xf32>
    %17 = arith.addf %12, %16 : vector<8x128xf32>
    %c2 = arith.constant 2 : index
    %c0_13 = arith.constant 0 : index
    %c0_14 = arith.constant 0 : index
    %18 = vector.load %arg3[%c2, %c0_13, %c0_14] : memref<3x8x4xbf16, #tpu.memory_space<vmem>>, vector<1x8x4xbf16>
    %19 = vector.shape_cast %18 : vector<1x8x4xbf16> to vector<8x4xbf16>
    %c0_15 = arith.constant 0 : index
    %c128_16 = arith.constant 128 : index
    %20 = vector.load %arg14[%c0_15, %c128_16] : memref<4x256xbf16, #tpu.memory_space<vmem>>, vector<4x128xbf16>
    %cst_17 = arith.constant dense<0.000000e+00> : vector<8x128xf32>
    %21 = tpu.matmul %19, %20, %cst_17 {dimension_numbers = #tpu.dot_dimension_numbers<[1], [0], [0], [1], [0, 0, 1, 1], [], []>} : vector<8x4xbf16>, vector<4x128xbf16>, vector<8x128xf32> -> vector<8x128xf32>
    %22 = arith.addf %17, %21 : vector<8x128xf32>
    %c0_18 = arith.constant 0 : index
    %c0_19 = arith.constant 0 : index
    %23 = vector.load %arg4[%c0_18, %c0_19] : memref<8x1xf32, #tpu.memory_space<vmem>>, vector<8x1xf32>
    %24 = vector.broadcast %23 : vector<8x1xf32> to vector<8x128xf32>
    %25 = arith.addf %22, %24 : vector<8x128xf32>
    %cst_20 = arith.constant 0.000000e+00 : f32
    %26 = vector.broadcast %cst_20 : f32 to vector<8x128xf32>
    %27 = arith.maximumf %25, %26 : vector<8x128xf32>
    %28 = arith.truncf %27 : vector<8x128xf32> to vector<8x128xbf16>
    %c0_21 = arith.constant 0 : index
    %c128_22 = arith.constant 128 : index
    %29 = vector.load %arg15[%c0_21, %c128_22] : memref<8x256xbf16, #tpu.memory_space<vmem>>, vector<8x128xbf16>
    tpu.vector_store %arg15[%c0_21, %c128_22], %28 {strides = array<i32>} : memref<8x256xbf16, #tpu.memory_space<vmem>>, vector<8x128xbf16>,
    %cst_23 = arith.constant 0.000000e+00 : f32
    %30 = vector.broadcast %cst_23 : f32 to vector<8x128xf32>
    %c0_24 = arith.constant 0 : index
    %c0_25 = arith.constant 0 : index
    %c0_26 = arith.constant 0 : index
    %31 = vector.load %arg5[%c0_24, %c0_25, %c0_26] : memref<3x8x8xbf16, #tpu.memory_space<vmem>>, vector<1x8x8xbf16>
    %32 = vector.shape_cast %31 : vector<1x8x8xbf16> to vector<8x8xbf16>
    %c0_27 = arith.constant 0 : index
    %c126_28 = arith.constant 126 : index
    %33 = vector.load %arg15[%c0_27, %c126_28] : memref<8x256xbf16, #tpu.memory_space<vmem>>, vector<8x128xbf16>
    %cst_29 = arith.constant dense<0.000000e+00> : vector<8x128xf32>
    %34 = tpu.matmul %32, %33, %cst_29 {dimension_numbers = #tpu.dot_dimension_numbers<[1], [0], [0], [1], [0, 0, 1, 1], [], []>} : vector<8x8xbf16>, vector<8x128xbf16>, vector<8x128xf32> -> vector<8x128xf32>
    %35 = arith.addf %30, %34 : vector<8x128xf32>
    %c1_30 = arith.constant 1 : index
    %c0_31 = arith.constant 0 : index
    %c0_32 = arith.constant 0 : index
    %36 = vector.load %arg5[%c1_30, %c0_31, %c0_32] : memref<3x8x8xbf16, #tpu.memory_space<vmem>>, vector<1x8x8xbf16>
    %37 = vector.shape_cast %36 : vector<1x8x8xbf16> to vector<8x8xbf16>
    %c0_33 = arith.constant 0 : index
    %c127_34 = arith.constant 127 : index
    %38 = vector.load %arg15[%c0_33, %c127_34] : memref<8x256xbf16, #tpu.memory_space<vmem>>, vector<8x128xbf16>
    %cst_35 = arith.constant dense<0.000000e+00> : vector<8x128xf32>
    %39 = tpu.matmul %37, %38, %cst_35 {dimension_numbers = #tpu.dot_dimension_numbers<[1], [0], [0], [1], [0, 0, 1, 1], [], []>} : vector<8x8xbf16>, vector<8x128xbf16>, vector<8x128xf32> -> vector<8x128xf32>
    %40 = arith.addf %35, %39 : vector<8x128xf32>
    %c2_36 = arith.constant 2 : index
    %c0_37 = arith.constant 0 : index
    %c0_38 = arith.constant 0 : index
    %41 = vector.load %arg5[%c2_36, %c0_37, %c0_38] : memref<3x8x8xbf16, #tpu.memory_space<vmem>>, vector<1x8x8xbf16>
    %42 = vector.shape_cast %41 : vector<1x8x8xbf16> to vector<8x8xbf16>
    %c0_39 = arith.constant 0 : index
    %c128_40 = arith.constant 128 : index
    %43 = vector.load %arg15[%c0_39, %c128_40] : memref<8x256xbf16, #tpu.memory_space<vmem>>, vector<8x128xbf16>
    %cst_41 = arith.constant dense<0.000000e+00> : vector<8x128xf32>
    %44 = tpu.matmul %42, %43, %cst_41 {dimension_numbers = #tpu.dot_dimension_numbers<[1], [0], [0], [1], [0, 0, 1, 1], [], []>} : vector<8x8xbf16>, vector<8x128xbf16>, vector<8x128xf32> -> vector<8x128xf32>
    %45 = arith.addf %40, %44 : vector<8x128xf32>
    %c0_42 = arith.constant 0 : index
    %c0_43 = arith.constant 0 : index
    %46 = vector.load %arg6[%c0_42, %c0_43] : memref<8x1xf32, #tpu.memory_space<vmem>>, vector<8x1xf32>
    %47 = vector.broadcast %46 : vector<8x1xf32> to vector<8x128xf32>
    %48 = arith.addf %45, %47 : vector<8x128xf32>
    %cst_44 = arith.constant 0.000000e+00 : f32
    %49 = vector.broadcast %cst_44 : f32 to vector<8x128xf32>
    %50 = arith.maximumf %48, %49 : vector<8x128xf32>
    %c0_45 = arith.constant 0 : index
    %c0_46 = arith.constant 0 : index
    %51 = vector.load %arg7[%c0_45, %c0_46] : memref<8x4xbf16, #tpu.memory_space<vmem>>, vector<8x4xbf16>
    %cst_47 = arith.constant dense<0.000000e+00> : vector<8x128xf32>
    %52 = tpu.matmul %51, %5, %cst_47 {dimension_numbers = #tpu.dot_dimension_numbers<[1], [0], [0], [1], [0, 0, 1, 1], [], []>} : vector<8x4xbf16>, vector<4x128xbf16>, vector<8x128xf32> -> vector<8x128xf32>
    %c0_48 = arith.constant 0 : index
    %c0_49 = arith.constant 0 : index
    %53 = vector.load %arg8[%c0_48, %c0_49] : memref<8x1xf32, #tpu.memory_space<vmem>>, vector<8x1xf32>
    %54 = vector.broadcast %53 : vector<8x1xf32> to vector<8x128xf32>
    %55 = arith.addf %52, %54 : vector<8x128xf32>
    %56 = arith.addf %50, %55 : vector<8x128xf32>
    %cst_50 = arith.constant 0.000000e+00 : f32
    %57 = vector.broadcast %cst_50 : f32 to vector<8x128xf32>
    %58 = arith.maximumf %56, %57 : vector<8x128xf32>
    %59 = arith.truncf %58 : vector<8x128xf32> to vector<8x128xbf16>
    %c0_51 = arith.constant 0 : index
    %c128_52 = arith.constant 128 : index
    %60 = vector.load %arg16[%c0_51, %c128_52] : memref<8x256xbf16, #tpu.memory_space<vmem>>, vector<8x128xbf16>
    tpu.vector_store %arg16[%c0_51, %c128_52], %59 {strides = array<i32>} : memref<8x256xbf16, #tpu.memory_space<vmem>>, vector<8x128xbf16>,
    %cst_53 = arith.constant 0.000000e+00 : f32
    %61 = vector.broadcast %cst_53 : f32 to vector<8x128xf32>
    %c0_54 = arith.constant 0 : index
    %c0_55 = arith.constant 0 : index
    %c0_56 = arith.constant 0 : index
    %62 = vector.load %arg9[%c0_54, %c0_55, %c0_56] : memref<3x8x8xbf16, #tpu.memory_space<vmem>>, vector<1x8x8xbf16>
    %63 = vector.shape_cast %62 : vector<1x8x8xbf16> to vector<8x8xbf16>
    %c0_57 = arith.constant 0 : index
    %c124 = arith.constant 124 : index
    %64 = vector.load %arg16[%c0_57, %c124] : memref<8x256xbf16, #tpu.memory_space<vmem>>, vector<8x128xbf16>
    %cst_58 = arith.constant dense<0.000000e+00> : vector<8x128xf32>
    %65 = tpu.matmul %63, %64, %cst_58 {dimension_numbers = #tpu.dot_dimension_numbers<[1], [0], [0], [1], [0, 0, 1, 1], [], []>} : vector<8x8xbf16>, vector<8x128xbf16>, vector<8x128xf32> -> vector<8x128xf32>
    %66 = arith.addf %61, %65 : vector<8x128xf32>
    %c1_59 = arith.constant 1 : index
    %c0_60 = arith.constant 0 : index
    %c0_61 = arith.constant 0 : index
    %67 = vector.load %arg9[%c1_59, %c0_60, %c0_61] : memref<3x8x8xbf16, #tpu.memory_space<vmem>>, vector<1x8x8xbf16>
    %68 = vector.shape_cast %67 : vector<1x8x8xbf16> to vector<8x8xbf16>
    %c0_62 = arith.constant 0 : index
    %c126_63 = arith.constant 126 : index
    %69 = vector.load %arg16[%c0_62, %c126_63] : memref<8x256xbf16, #tpu.memory_space<vmem>>, vector<8x128xbf16>
    %cst_64 = arith.constant dense<0.000000e+00> : vector<8x128xf32>
    %70 = tpu.matmul %68, %69, %cst_64 {dimension_numbers = #tpu.dot_dimension_numbers<[1], [0], [0], [1], [0, 0, 1, 1], [], []>} : vector<8x8xbf16>, vector<8x128xbf16>, vector<8x128xf32> -> vector<8x128xf32>
    %71 = arith.addf %66, %70 : vector<8x128xf32>
    %c2_65 = arith.constant 2 : index
    %c0_66 = arith.constant 0 : index
    %c0_67 = arith.constant 0 : index
    %72 = vector.load %arg9[%c2_65, %c0_66, %c0_67] : memref<3x8x8xbf16, #tpu.memory_space<vmem>>, vector<1x8x8xbf16>
    %73 = vector.shape_cast %72 : vector<1x8x8xbf16> to vector<8x8xbf16>
    %c0_68 = arith.constant 0 : index
    %c128_69 = arith.constant 128 : index
    %74 = vector.load %arg16[%c0_68, %c128_69] : memref<8x256xbf16, #tpu.memory_space<vmem>>, vector<8x128xbf16>
    %cst_70 = arith.constant dense<0.000000e+00> : vector<8x128xf32>
    %75 = tpu.matmul %73, %74, %cst_70 {dimension_numbers = #tpu.dot_dimension_numbers<[1], [0], [0], [1], [0, 0, 1, 1], [], []>} : vector<8x8xbf16>, vector<8x128xbf16>, vector<8x128xf32> -> vector<8x128xf32>
    %76 = arith.addf %71, %75 : vector<8x128xf32>
    %c0_71 = arith.constant 0 : index
    %c0_72 = arith.constant 0 : index
    %77 = vector.load %arg10[%c0_71, %c0_72] : memref<8x1xf32, #tpu.memory_space<vmem>>, vector<8x1xf32>
    %78 = vector.broadcast %77 : vector<8x1xf32> to vector<8x128xf32>
    %79 = arith.addf %76, %78 : vector<8x128xf32>
    %cst_73 = arith.constant 0.000000e+00 : f32
    %80 = vector.broadcast %cst_73 : f32 to vector<8x128xf32>
    %81 = arith.maximumf %79, %80 : vector<8x128xf32>
    %82 = arith.truncf %81 : vector<8x128xf32> to vector<8x128xbf16>
    %c0_74 = arith.constant 0 : index
    %c128_75 = arith.constant 128 : index
    %83 = vector.load %arg17[%c0_74, %c128_75] : memref<8x256xbf16, #tpu.memory_space<vmem>>, vector<8x128xbf16>
    tpu.vector_store %arg17[%c0_74, %c128_75], %82 {strides = array<i32>} : memref<8x256xbf16, #tpu.memory_space<vmem>>, vector<8x128xbf16>,
    %cst_76 = arith.constant 0.000000e+00 : f32
    %84 = vector.broadcast %cst_76 : f32 to vector<8x128xf32>
    %c0_77 = arith.constant 0 : index
    %c0_78 = arith.constant 0 : index
    %c0_79 = arith.constant 0 : index
    %85 = vector.load %arg11[%c0_77, %c0_78, %c0_79] : memref<3x8x8xbf16, #tpu.memory_space<vmem>>, vector<1x8x8xbf16>
    %86 = vector.shape_cast %85 : vector<1x8x8xbf16> to vector<8x8xbf16>
    %c0_80 = arith.constant 0 : index
    %c124_81 = arith.constant 124 : index
    %87 = vector.load %arg17[%c0_80, %c124_81] : memref<8x256xbf16, #tpu.memory_space<vmem>>, vector<8x128xbf16>
    %cst_82 = arith.constant dense<0.000000e+00> : vector<8x128xf32>
    %88 = tpu.matmul %86, %87, %cst_82 {dimension_numbers = #tpu.dot_dimension_numbers<[1], [0], [0], [1], [0, 0, 1, 1], [], []>} : vector<8x8xbf16>, vector<8x128xbf16>, vector<8x128xf32> -> vector<8x128xf32>
    %89 = arith.addf %84, %88 : vector<8x128xf32>
    %c1_83 = arith.constant 1 : index
    %c0_84 = arith.constant 0 : index
    %c0_85 = arith.constant 0 : index
    %90 = vector.load %arg11[%c1_83, %c0_84, %c0_85] : memref<3x8x8xbf16, #tpu.memory_space<vmem>>, vector<1x8x8xbf16>
    %91 = vector.shape_cast %90 : vector<1x8x8xbf16> to vector<8x8xbf16>
    %c0_86 = arith.constant 0 : index
    %c126_87 = arith.constant 126 : index
    %92 = vector.load %arg17[%c0_86, %c126_87] : memref<8x256xbf16, #tpu.memory_space<vmem>>, vector<8x128xbf16>
    %cst_88 = arith.constant dense<0.000000e+00> : vector<8x128xf32>
    %93 = tpu.matmul %91, %92, %cst_88 {dimension_numbers = #tpu.dot_dimension_numbers<[1], [0], [0], [1], [0, 0, 1, 1], [], []>} : vector<8x8xbf16>, vector<8x128xbf16>, vector<8x128xf32> -> vector<8x128xf32>
    %94 = arith.addf %89, %93 : vector<8x128xf32>
    %c2_89 = arith.constant 2 : index
    %c0_90 = arith.constant 0 : index
    %c0_91 = arith.constant 0 : index
    %95 = vector.load %arg11[%c2_89, %c0_90, %c0_91] : memref<3x8x8xbf16, #tpu.memory_space<vmem>>, vector<1x8x8xbf16>
    %96 = vector.shape_cast %95 : vector<1x8x8xbf16> to vector<8x8xbf16>
    %c0_92 = arith.constant 0 : index
    %c128_93 = arith.constant 128 : index
    %97 = vector.load %arg17[%c0_92, %c128_93] : memref<8x256xbf16, #tpu.memory_space<vmem>>, vector<8x128xbf16>
    %cst_94 = arith.constant dense<0.000000e+00> : vector<8x128xf32>
    %98 = tpu.matmul %96, %97, %cst_94 {dimension_numbers = #tpu.dot_dimension_numbers<[1], [0], [0], [1], [0, 0, 1, 1], [], []>} : vector<8x8xbf16>, vector<8x128xbf16>, vector<8x128xf32> -> vector<8x128xf32>
    %99 = arith.addf %94, %98 : vector<8x128xf32>
    %c0_95 = arith.constant 0 : index
    %c0_96 = arith.constant 0 : index
    %100 = vector.load %arg12[%c0_95, %c0_96] : memref<8x1xf32, #tpu.memory_space<vmem>>, vector<8x1xf32>
    %101 = vector.broadcast %100 : vector<8x1xf32> to vector<8x128xf32>
    %102 = arith.addf %99, %101 : vector<8x128xf32>
    %cst_97 = arith.constant 0.000000e+00 : f32
    %103 = vector.broadcast %cst_97 : f32 to vector<8x128xf32>
    %104 = arith.maximumf %102, %103 : vector<8x128xf32>
    %105 = arith.extf %59 : vector<8x128xbf16> to vector<8x128xf32>
    %106 = arith.addf %104, %105 : vector<8x128xf32>
    %cst_98 = arith.constant 0.000000e+00 : f32
    %107 = vector.broadcast %cst_98 : f32 to vector<8x128xf32>
    %108 = arith.maximumf %106, %107 : vector<8x128xf32>
    %c0_99 = arith.constant 0 : index
    %c0_100 = arith.constant 0 : index
    %c0_101 = arith.constant 0 : index
    %109 = vector.load %arg13[%c0_99, %c0_100, %c0_101] : memref<1x8x128xf32, #tpu.memory_space<vmem>>, vector<1x8x128xf32>
    %110 = vector.shape_cast %109 : vector<1x8x128xf32> to vector<8x128xf32>
    %111 = vector.shape_cast %108 : vector<8x128xf32> to vector<1x8x128xf32>
    tpu.vector_store %arg13[%c0_99, %c0_100, %c0_101], %111 {strides = array<i32>} : memref<1x8x128xf32, #tpu.memory_space<vmem>>, vector<1x8x128xf32>,
    return
  }
  func.func @transform_0(%arg0: i32, %arg1: i32) -> (i32, i32, i32) {
    %c0_i32 = arith.constant 0 : i32
    %c0_i32_0 = arith.constant 0 : i32
    return %arg0, %c0_i32, %arg1 : i32, i32, i32
  }
  func.func @transform_1(%arg0: i32, %arg1: i32) -> (i32, i32, i32) {
    %c0_i32 = arith.constant 0 : i32
    %c0_i32_0 = arith.constant 0 : i32
    %c0_i32_1 = arith.constant 0 : i32
    %c0_i32_2 = arith.constant 0 : i32
    return %c0_i32, %c0_i32_0, %c0_i32_1 : i32, i32, i32
  }
  func.func @transform_2(%arg0: i32, %arg1: i32) -> (i32, i32) {
    %c0_i32 = arith.constant 0 : i32
    %c0_i32_0 = arith.constant 0 : i32
    %c0_i32_1 = arith.constant 0 : i32
    return %c0_i32, %c0_i32_0 : i32, i32
  }
  func.func @transform_3(%arg0: i32, %arg1: i32) -> (i32, i32, i32) {
    %c0_i32 = arith.constant 0 : i32
    %c0_i32_0 = arith.constant 0 : i32
    %c0_i32_1 = arith.constant 0 : i32
    %c0_i32_2 = arith.constant 0 : i32
    return %c0_i32, %c0_i32_0, %c0_i32_1 : i32, i32, i32
  }
  func.func @transform_4(%arg0: i32, %arg1: i32) -> (i32, i32) {
    %c0_i32 = arith.constant 0 : i32
    %c0_i32_0 = arith.constant 0 : i32
    %c0_i32_1 = arith.constant 0 : i32
    return %c0_i32, %c0_i32_0 : i32, i32
  }
  func.func @transform_5(%arg0: i32, %arg1: i32) -> (i32, i32) {
    %c0_i32 = arith.constant 0 : i32
    %c0_i32_0 = arith.constant 0 : i32
    %c0_i32_1 = arith.constant 0 : i32
    return %c0_i32, %c0_i32_0 : i32, i32
  }
  func.func @transform_6(%arg0: i32, %arg1: i32) -> (i32, i32) {
    %c0_i32 = arith.constant 0 : i32
    %c0_i32_0 = arith.constant 0 : i32
    %c0_i32_1 = arith.constant 0 : i32
    return %c0_i32, %c0_i32_0 : i32, i32
  }
  func.func @transform_7(%arg0: i32, %arg1: i32) -> (i32, i32, i32) {
    %c0_i32 = arith.constant 0 : i32
    %c0_i32_0 = arith.constant 0 : i32
    %c0_i32_1 = arith.constant 0 : i32
    %c0_i32_2 = arith.constant 0 : i32
    return %c0_i32, %c0_i32_0, %c0_i32_1 : i32, i32, i32
  }
  func.func @transform_8(%arg0: i32, %arg1: i32) -> (i32, i32) {
    %c0_i32 = arith.constant 0 : i32
    %c0_i32_0 = arith.constant 0 : i32
    %c0_i32_1 = arith.constant 0 : i32
    return %c0_i32, %c0_i32_0 : i32, i32
  }
  func.func @transform_9(%arg0: i32, %arg1: i32) -> (i32, i32, i32) {
    %c0_i32 = arith.constant 0 : i32
    %c0_i32_0 = arith.constant 0 : i32
    %c0_i32_1 = arith.constant 0 : i32
    %c0_i32_2 = arith.constant 0 : i32
    return %c0_i32, %c0_i32_0, %c0_i32_1 : i32, i32, i32
  }
  func.func @transform_10(%arg0: i32, %arg1: i32) -> (i32, i32) {
    %c0_i32 = arith.constant 0 : i32
    %c0_i32_0 = arith.constant 0 : i32
    %c0_i32_1 = arith.constant 0 : i32
    return %c0_i32, %c0_i32_0 : i32, i32
  }
  func.func @transform_11(%arg0: i32, %arg1: i32) -> (i32, i32, i32) {
    %c0_i32 = arith.constant 0 : i32
    %c0_i32_0 = arith.constant 0 : i32
    return %arg0, %c0_i32, %arg1 : i32, i32, i32
  }
}

</mosaic_0001>

<bundles_post_ra>
// kernel: tpu_custom_call.1
= control target key start
LH: loop header
LB: loop body
LE: loop exit
PB: predicated region body
PF: predicated region fallthrough
CT: control target
= control target key end

     0   :  { %s1879_s0 = inlined_call_operand.vmem [shape: f32[2,4,128], index: 0, kind: input, shape index: {}]   ;;  %s1880_s1 = inlined_call_operand.vmem [shape: bf16[3,8,4], index: 1, kind: input, shape index: {}]   ;;  %s1881_s2 = inlined_call_operand.vmem [shape: f32[8,1], index: 2, kind: input, shape index: {}]   ;;  %s1882_s3 = inlined_call_operand.vmem [shape: bf16[3,8,8], index: 3, kind: input, shape index: {}]   ;;  %s1883_s4 = inlined_call_operand.vmem [shape: f32[8,1], index: 4, kind: input, shape index: {}]   ;;  %s1884_s5 = inlined_call_operand.vmem [shape: bf16[8,4], index: 5, kind: input, shape index: {}]   ;;  %s1885_s6 = inlined_call_operand.vmem [shape: f32[8,1], index: 6, kind: input, shape index: {}]   ;;  %s1886_s7 = inlined_call_operand.vmem [shape: bf16[3,8,8], index: 7, kind: input, shape index: {}]   ;;  %s1887_s8 = inlined_call_operand.vmem [shape: f32[8,1], index: 8, kind: input, shape index: {}]   ;;  %s1888_s9 = inlined_call_operand.vmem [shape: bf16[3,8,8], index: 9, kind: input, shape index: {}]   ;;  %s1889_s10 = inlined_call_operand.vmem [shape: f32[8,1], index: 10, kind: input, shape index: {}]   ;;  %s1890_s11 = inlined_call_operand.hbm [shape: f32[2,8,128], index: 11, kind: output, shape index: {}]  }
   0x1   :  { %1891 = sst [smem:[#allocation9_spill]] %s1879_s0 }
   0x2   :  { %1892 = sst [smem:[#allocation10_spill]] %s1880_s1 }
   0x3   :  { %16 = vsyncpa [#allocation7], 0 }
   0x4   :  { %18 = vsyncpa [#allocation7 + $0x1], 0  ;;  %s1616_s17 = smov 0   ;;  %s1618_s18 = smov 0  }
   0x5   :  { %s1620_s19 = smov 0   ;;  %s1622_s20 = smov 0  }
   0x6   :  { %s1624_s21 = smov 0   ;;  %s1626_s22 = smov 0  }
   0x7 LB: > { %s1257_s23 = sadd.s32 4294967295, %s1547_s22   ;;  %s1258_s24 = sadd.s32 4294967294, %s1547_s22   ;;  %s1547_s22 = sphi %s1626_s22, %s24_s22   ;;  %s1543_s21 = sphi %s1624_s21, %s1901_s21   ;;  %s1539_s20 = sphi %s1622_s20, %s1900_s20   ;;  %s1535_s19 = sphi %s1620_s19, %s1899_s19   ;;  %s1531_s18 = sphi %s1618_s18, %s1898_s18   ;;  %s1527_s17 = sphi %s1616_s17, %s1897_s17  }
   0x8   : > { %s36_s25 = sadd.s32 1, %s1543_s21  ;;  %s283_s26 = sadd.s32 1, %s1535_s19 }
   0x9   : > { %p38_p0 = scmp.ge.s32.totalorder %s36_s25, 2  ;;  %p293_p1 = scmp.ne.s32.totalorder %s1535_s19, %s1531_s18 }
   0xa   : > { %p294_p2 = scmp.eq.s32.totalorder %s1257_s23, 1  ;;  %p299_p3 = scmp.ne.s32.totalorder %s1531_s18, %s1527_s17 }
   0xb   : > { %s1903_s25 = smov (%p38_p0, %s36_s25), 0  ;;  %p300_p5 = scmp.eq.s32.totalorder %s1258_s24, 1 }
   0xc   : > { %p1656_p4 = por %p294_p2, %p293_p1  ;;  %s278_s28 = ssub.s32 %s1543_s21, %s1903_s25 }
   0xd   : > { %p1261_p6 = scmp.ge.s32.totalorder %s1547_s22, 1  ;;  %p281_p7 = scmp.eq.s32.totalorder %s278_s28, 0 }
   0xe   : > { %p1663_p8 = por %p300_p5, %p299_p3  ;;  %p358_p9 = scmp.lt.s32.totalorder %s1547_s22, 3 }
   0xf   : > { %s1669_s30 = scalar_select %p281_p7, %s1535_s19, %s283_s26  }
  0x10   : > { %p359_p10 = pnand %p1261_p6, %p358_p9 }
  0x11   : > { %p400_p11 = scmp.lt.s32.totalorder (!%p359_p10), %s1539_s20, 1  ;;  %v1549_v0 = vmov (!%p359_p10), 0   ;;  %s1895_s0 = sld [smem:[#allocation9_spill]] (!%p359_p10)  ;;  %v1550_v3 = vmov (!%p359_p10), 0.0   ;;  %vm1551_vm0 = vmmov (!%p359_p10), 0   ;;  %v588_v6 = vld [vmem:[%s1881_s2] sm:$0xff] (!%p359_p10) }
  0x12   : > { %362 = sbr.rel (%p359_p10) target bundleno = 1490 (0x5d2), region = 64  ;;  %412 = vst [vmem:[#allocation2] sm:$0x3] (!%p359_p10), %v1549_v0  ;;  %413 = vst [vmem:[#allocation3] sm:$0xf] (!%p359_p10), %v1549_v0  ;;  %1461 = vset.pattern.permute.xlu0 (!%p359_p10), %v1549_v0  ;;  %1462 = vset.pattern.permute.xlu1 (!%p359_p10), %v1549_v0  ;;  %s1552_s23 = smov (!%p359_p10), 2  }
  0x13   : > { %414 = vst [vmem:[#allocation4] sm:$0xf] (!%p359_p10), %v1549_v0  ;;  %415 = vst [vmem:[#allocation5] sm:$0xf] (!%p359_p10), %v1549_v0  ;;  %1322 = vmatprep.subr.bf16.mxu0 (!%p359_p10), %v1550_v3  ;;  %1328 = vmatprep.subr.bf16.mxu1 (!%p359_p10), %v1550_v3  ;;  %s1553_s24 = smov (!%p359_p10), 1   ;;  %vm436_vm1 = vcmask (!%p359_p10), 7168  }
  0x14   : > { %1324 = vmatprep.mubr.msk.bf16.mxu0 (!%p359_p10), %vm1551_vm0, %v1550_v3  ;;  %1330 = vmatprep.mubr.msk.bf16.mxu1 (!%p359_p10), %vm1551_vm0, %v1550_v3  ;;  %vm490_vm2 = vcmask (!%p359_p10), 15360   ;;  %vm442_vm3 = vcmask (!%p359_p10), 1041408   ;;  %s1896_s1 = sld [smem:[#allocation10_spill]] (!%p359_p10)  ;;  %vm438_vm4 = vcmask (!%p359_p10), 31744   ;;  %v761_v40 = vld [vmem:[%s1883_s4] sm:$0xff] (!%p359_p10)  ;;  %vm616_vm5 = vcmask (!%p359_p10), 1043456  }
  0x15   : > { %v770_v42 = vld [vmem:[%s1885_s6] sm:$0xff] (!%p359_p10)  ;;  %vm612_vm6 = vcmask (!%p359_p10), 64512   ;;  %v1275_v56 = vld [vmem:[%s1882_s3 + $0x8] sm:$0xf] (!%p359_p10)  ;;  %s1554_s15 = smov (!%p359_p10), 4   ;;  %s1293_s26 = sshll.u32 (!%p359_p10), %s1539_s20, 7 }
  0x16   : > { %v1270_v47 = vld [vmem:[%s1882_s3 + $0x4] sm:$0xf] (!%p359_p10)  ;;  %v598_v54 = vld [vmem:[%s1882_s3] sm:$0xf] (!%p359_p10) }
  0x17   : > { %v769_v57 = vld [vmem:[%s1884_s5] sm:$0xf] (!%p359_p10) }
  0x19   : > { %s401_s12 = scalar_select %p400_p11, %s1539_s20, 1 }
  0x1a   : > { %v1264_v16 = vld [vmem:[%s1896_s1 + $0x4] sm:$0xf]  ;;  %v419_v17 = vld [vmem:[%s1896_s1] sm:$0xf]  ;;  %v1268_v19 = vld [vmem:[%s1896_s1 + $0x8] sm:$0xf] }
  0x1b   : > { %s1263_s13 = sshll.u32 %s401_s12, 2  ;;  %s1555_s20 = smov [#allocation6]  }
  0x1c   : > { %s406_s16 = scalar_lea.vmem %s1895_s0, %s1263_s13  ;;  %s1832_s13 = scalar_lea.hbm %s1890_s11, %s1293_s26 }
  0x1d   : > { %v416_v1 = vld [vmem:[%s406_s16] sm:$0xf]  ;;  %s397_s16 = sand.u32 1, %s1531_s18  }
  0x1e   : > { %v1676_v2 = vpack.c.bf16 %v416_v1, %v416_v1  ;;  %s1172_s14 = scalar_lea.sflag [#allocation7], %s397_s16 }
  0x20   : > { %418 = vst [vmem:[#allocation2 + $0x2] sm:$0x3] %v1676_v2  ;;  %v780_v55 = vsel %vm442_vm3, %v1676_v2, 0 }
  0x27   : > { %v1265_v4 = vld.sshfl [vmem:[#allocation2] sm:$0x33 pattern:$0x76325410] }
  0x28   : > { %486 = vrot.lane.b32.xlu1 %v1265_v4, %s1552_s23  ;;  %432 = vrot.lane.b32.xlu0 %v1265_v4, %s1553_s24  ;;  %v431_v5 = vcombine.high %v1265_v4, %v1265_v4  ;;  %v540_v13 = vld [vmem:[#allocation2 + $0x2] sm:$0x3] }
  0x29   : > { %v545_v18 = vsel %vm442_vm3, %v540_v13, 0 }
  0x2c   : > { %488 = vrot.lane.b32.xlu1 %v431_v5, %s1552_s23  ;;  %434 = vrot.lane.b32.xlu0 %v431_v5, %s1553_s24 }
  0x30   : > { %591 = vperm.xlu0 %1461, %v588_v6  }
  0x9a   : > { %v487_v7 = vpop.permute.xlu1 %486  ;;  %v433_v8 = vpop.permute.xlu0 %432 }
  0x9e   : > { %v489_v9 = vpop.permute.xlu1 %488  ;;  %v435_v10 = vpop.permute.xlu0 %434 }
  0x9f   : > { %v437_v11 = vsel %vm436_vm1, %v433_v8, %v435_v10  ;;  %v491_v12 = vsel %vm490_vm2, %v487_v7, %v489_v9 }
  0xa0   : > { %v444_v14 = vsel %vm442_vm3, %v437_v11, 0  ;;  %v496_v15 = vsel %vm442_vm3, %v491_v12, 0 }
  0xa1   : > { %1323 = vmatpush3.bf16.msra.mxu0 %v444_v14  ;;  %1329 = vmatpush3.bf16.msra.mxu1 %v496_v15 }
  0xa2   : > { %1334 = vmatprep.subr.bf16.mxu0 %v1550_v3  ;;  %1340 = vmatprep.subr.bf16.mxu1 %v1550_v3 }
  0xa4   : > { %1325 = vmatmul.mubr.msk.bf16.vlgmr.msra.gmra.mrb[0].mxu0 %vm438_vm4, %v1264_v16  ;;  %1331 = vmatmul.mubr.msk.bf16.vlgmr.msra.gmra.mrb[0].mxu1 %vm438_vm4, %v419_v17 }
  0xa5   : > { %1335 = vmatpush3.bf16.msra.mxu0 %v545_v18  ;;  %1336 = vmatprep.mubr.msk.bf16.mxu0 %vm1551_vm0, %v1550_v3 }
  0xa6   : > { %1342 = vmatprep.mubr.msk.bf16.mxu1 %vm1551_vm0, %v1550_v3  ;;  %1346 = vmatprep.subr.bf16.mxu0 %v1550_v3 }
  0xac   : > { %1337 = vmatmul.mubr.msk.bf16.vlgmr.msra.gmra.mrb[4].mxu0 %vm438_vm4, %v1268_v19 }
  0xad   : > { %1348 = vmatprep.mubr.msk.bf16.mxu0 %vm1551_vm0, %v1550_v3 }
  0xaf   : > { %v592_v30 = vpop.permute.xlu0 %591 }
 0x177   : > { %v480_v20 = vpop.f32.mrb[0].mxu0  ;;  %v532_v21 = vpop.f32.mrb[0].mxu1 }
 0x178   : > { %v533_v22 = vadd.f32 %v532_v21, %v480_v20  ;;  %v1326_v23 = vpop.f32.mrb[1].mxu0  ;;  %v1332_v24 = vpop.f32.mrb[1].mxu1 }
 0x179   : > { %v483_v25 = vpop.f32.mrb[2].mxu0  ;;  %v535_v26 = vpop.f32.mrb[2].mxu1  ;;  %v988_v24 = vld [vmem:[%s1887_s8] sm:$0xff] }
 0x17a   : > { %v1327_v27 = vpop.f32.mrb[3].mxu0  ;;  %v1333_v28 = vpop.f32.mrb[3].mxu1 }
 0x17f   : > { %v581_v29 = vpop.f32.mrb[4].mxu0 }
 0x180   : > { %v587_v31 = vadd.f32 %v581_v29, %v533_v22  ;;  %v1338_v32 = vpop.f32.mrb[5].mxu0  ;;  %v1278_v29 = vld [vmem:[%s1886_s7 + $0x4] sm:$0xf] }
 0x181   : > { %v584_v33 = vpop.f32.mrb[6].mxu0 }
 0x182   : > { %v594_v34 = vadd.f32 %v592_v30, %v587_v31  ;;  %v1339_v35 = vpop.f32.mrb[7].mxu0 }
 0x184   : > { %v595_v36 = vmax.f32 %v594_v34, 0.0 }
 0x186   : > { %v596_v37 = vpack.c.bf16 %v595_v36, %v595_v36  ;;  %v826_v36 = vld [vmem:[%s1886_s7] sm:$0xf] }
 0x188   : > { %597 = vst [vmem:[#allocation3 + $0x4] sm:$0xf] %v596_v37  ;;  %v1283_v37 = vld [vmem:[%s1886_s7 + $0x8] sm:$0xf] }
 0x18f   : > { %v599_v38 = vld [vmem:[#allocation3] sm:$0xff] }
 0x190   : > { %v1271_v39 = vcombine.low %v599_v38, %v599_v38  ;;  %v1272_v41 = vcombine.high %v599_v38, %v599_v38  ;;  %v713_v48 = vld [vmem:[#allocation3 + $0x4] sm:$0xf] }
 0x191   : > { %v718_v53 = vsel %vm616_vm5, %v713_v48, 0 }
 0x192   : > { %660 = vrot.lane.b32.xlu0 %v1271_v39, %s1552_s23  ;;  %607 = vrot.lane.b32.xlu1 %v1271_v39, %s1553_s24 }
 0x196   : > { %764 = vperm.xlu0 %1461, %v761_v40   ;;  %609 = vrot.lane.b32.xlu1 %v1272_v41, %s1553_s24  ;;  %s1262_s24 = sshll.u32 %s397_s16, 3 }
 0x197   : > { %s399_s28 = scalar_lea.vmem [#allocation6], %s1262_s24  ;;  %s1473_s24 = sshll.u32 %s1555_s20, 4  ;;  %s1474_s24 = int_to_ptr.vmem [resolvable:$false] %s1473_s24 }
 0x198   : > { %s1186_s12 = sshll.u32 %s399_s28, 4  ;;  %s1475_s1 = scalar_lea.vmem %s1474_s24, 256  ;;  %s1834_s12 = int_to_ptr.vmem [resolvable:$true] %s1186_s12 }
 0x199   : > { %s1469_s0 = scalar_lea.vmem %s1834_s12, 128  ;;  %p1476_p1 = scmp.lt.s32.totalorder %s1834_s12, %s1474_s24 }
 0x19a   : > { %662 = vrot.lane.b32.xlu1 %v1272_v41, %s1552_s23  ;;  %p1470_p12 = scmp.ne.s32.totalorder %s1834_s12, %s1469_s0  ;;  %p1477_p2 = scmp.lt.s32.totalorder %s1475_s1, %s1469_s0 }
 0x19c   : > { %p1471_p13 = pnand %p1470_p12, %p1656_p4  ;;  %p1478_p3 = por %p1477_p2, %p1476_p1 }
 0x19e   : > { %773 = vperm.xlu1 %1462, %v770_v42   ;;  %p1472_p0 = pneg %p1471_p13 }
 0x1a0   : > { %p1479_p5 = pnand %p1478_p3, %p1472_p0 }
 0x204   : > { %v608_v43 = vpop.permute.xlu1 %607  ;;  %v661_v49 = vpop.permute.xlu0 %660 }
 0x208   : > { %v610_v44 = vpop.permute.xlu1 %609 }
 0x209   : > { %v611_v45 = vsel %vm436_vm1, %v608_v43, %v610_v44 }
 0x20a   : > { %v618_v46 = vsel %vm616_vm5, %v611_v45, 0 }
 0x20b   : > { %1341 = vmatpush3.bf16.msra.mxu1 %v618_v46 }
 0x20c   : > { %v663_v50 = vpop.permute.xlu1 %662  ;;  %1352 = vmatprep.subr.bf16.mxu1 %v1550_v3 }
 0x20d   : > { %v664_v51 = vsel %vm490_vm2, %v661_v49, %v663_v50 }
 0x20e   : > { %v669_v52 = vsel %vm616_vm5, %v664_v51, 0  ;;  %1343 = vmatmul.mubr.msk.bf16.vlgmr.msra.gmra.mrb[4].mxu1 %vm612_vm6, %v1270_v47 }
 0x20f   : > { %1347 = vmatpush3.bf16.msra.mxu0 %v669_v52  ;;  %1353 = vmatpush3.bf16.msra.mxu1 %v718_v53 }
 0x210   : > { %1354 = vmatprep.mubr.msk.bf16.mxu1 %vm1551_vm0, %v1550_v3  ;;  %1358 = vmatprep.subr.bf16.mxu0 %v1550_v3 }
 0x211   : > { %1364 = vmatprep.subr.bf16.mxu1 %v1550_v3 }
 0x212   : > { %1349 = vmatmul.mubr.msk.bf16.vlgmr.msra.gmra.mrb[8].mxu0 %vm612_vm6, %v598_v54 }
 0x213   : > { %1359 = vmatpush3.bf16.msra.mxu0 %v780_v55  ;;  %1360 = vmatprep.mubr.msk.bf16.mxu0 %vm1551_vm0, %v1550_v3 }
 0x214   : > { %1370 = vmatprep.subr.bf16.mxu0 %v1550_v3 }
 0x215   : > { %v765_v5 = vpop.permute.xlu0 %764 }
 0x216   : > { %1355 = vmatmul.mubr.msk.bf16.vlgmr.msra.gmra.mrb[8].mxu1 %vm612_vm6, %v1275_v56 }
 0x217   : > { %1366 = vmatprep.mubr.msk.bf16.mxu1 %vm1551_vm0, %v1550_v3 }
 0x21a   : > { %1361 = vmatmul.mubr.msk.bf16.vlgmr.msra.gmra.mrb[12].mxu0 %vm438_vm4, %v769_v57 }
 0x21b   : > { %1372 = vmatprep.mubr.msk.bf16.mxu0 %vm1551_vm0, %v1550_v3 }
 0x21d   : > { %v774_v9 = vpop.permute.xlu1 %773 }
 0x2e1   : > { %v654_v58 = vpop.f32.mrb[4].mxu1 }
 0x2e2   : > { %v1344_v59 = vpop.f32.mrb[5].mxu1 }
 0x2e3   : > { %v657_v60 = vpop.f32.mrb[6].mxu1  ;;  %v1159_v59 = vld [vmem:[%s1889_s10] sm:$0xff] }
 0x2e4   : > { %v1345_v61 = vpop.f32.mrb[7].mxu1 }
 0x2e5   : > { %v705_v62 = vpop.f32.mrb[8].mxu0 }
 0x2e6   : > { %v706_v63 = vadd.f32 %v705_v62, %v654_v58  ;;  %v1350_v0 = vpop.f32.mrb[9].mxu0 }
 0x2e7   : > { %v708_v1 = vpop.f32.mrb[10].mxu0  ;;  %v1285_v0 = vld [vmem:[%s1888_s9 + $0x4] sm:$0xf] }
 0x2e8   : > { %v1351_v2 = vpop.f32.mrb[11].mxu0 }
 0x2e9   : > { %v754_v4 = vpop.f32.mrb[8].mxu1 }
 0x2ea   : > { %v760_v6 = vadd.f32 %v754_v4, %v706_v63  ;;  %v1356_v7 = vpop.f32.mrb[9].mxu1 }
 0x2eb   : > { %v757_v8 = vpop.f32.mrb[10].mxu1 }
 0x2ec   : > { %v767_v10 = vadd.f32 %v765_v5, %v760_v6  ;;  %v1357_v11 = vpop.f32.mrb[11].mxu1  ;;  %v998_v8 = vld [vmem:[%s1888_s9] sm:$0xf] }
 0x2ed   : > { %v816_v12 = vpop.f32.mrb[12].mxu0 }
 0x2ee   : > { %v768_v13 = vmax.f32 %v767_v10, 0.0  ;;  %v817_v14 = vadd.f32 %v816_v12, %v774_v9  ;;  %v1362_v15 = vpop.f32.mrb[13].mxu0  ;;  %v1290_v9 = vld [vmem:[%s1888_s9 + $0x8] sm:$0xf] }
 0x2ef   : > { %v819_v16 = vpop.f32.mrb[14].mxu0 }
 0x2f0   : > { %v822_v17 = vadd.f32 %v817_v14, %v768_v13  ;;  %v1363_v18 = vpop.f32.mrb[15].mxu0 }
 0x2f2   : > { %v823_v19 = vmax.f32 %v822_v17, 0.0 }
 0x2f4   : > { %v1763_v20 = vpack.c.bf16 %v823_v19, %v823_v19 }
 0x2f6   : > { %825 = vst [vmem:[#allocation4 + $0x4] sm:$0xf] %v1763_v20 }
 0x2fd   : > { %v827_v21 = vld [vmem:[#allocation4] sm:$0xff] }
 0x2fe   : > { %v1280_v22 = vcombine.high %v827_v21, %v827_v21  ;;  %v1279_v23 = vcombine.low %v827_v21, %v827_v21  ;;  %v940_v30 = vld [vmem:[#allocation4 + $0x4] sm:$0xf] }
 0x2ff   : > { %v945_v35 = vsel %vm616_vm5, %v940_v30, 0 }
 0x300   : > { %837 = vrot.lane.b32.xlu1 %v1280_v22, %s1552_s23  ;;  %835 = vrot.lane.b32.xlu0 %v1279_v23, %s1552_s23 }
 0x304   : > { %888 = vrot.lane.b32.xlu1 %v1280_v22, %s1554_s15  ;;  %886 = vrot.lane.b32.xlu0 %v1279_v23, %s1554_s15 }
 0x308   : > { %991 = vperm.xlu0 %1461, %v988_v24  }
 0x372   : > { %v838_v25 = vpop.permute.xlu1 %837  ;;  %v836_v26 = vpop.permute.xlu0 %835 }
 0x373   : > { %v839_v27 = vsel %vm490_vm2, %v836_v26, %v838_v25  ;;  %v1167_v26 = vunpack.c.l.bf16 %v1763_v20 }
 0x374   : > { %v844_v28 = vsel %vm616_vm5, %v839_v27, 0 }
 0x375   : > { %1365 = vmatpush3.bf16.msra.mxu1 %v844_v28 }
 0x376   : > { %v889_v31 = vpop.permute.xlu1 %888  ;;  %v887_v32 = vpop.permute.xlu0 %886  ;;  %1376 = vmatprep.subr.bf16.mxu1 %v1550_v3 }
 0x377   : > { %v891_v33 = vsel %vm438_vm4, %v887_v32, %v889_v31 }
 0x378   : > { %v896_v34 = vsel %vm616_vm5, %v891_v33, 0  ;;  %1367 = vmatmul.mubr.msk.bf16.vlgmr.msra.gmra.mrb[12].mxu1 %vm612_vm6, %v1278_v29 }
 0x379   : > { %1371 = vmatpush3.bf16.msra.mxu0 %v896_v34  ;;  %1377 = vmatpush3.bf16.msra.mxu1 %v945_v35 }
 0x37a   : > { %1378 = vmatprep.mubr.msk.bf16.mxu1 %vm1551_vm0, %v1550_v3  ;;  %1382 = vmatprep.subr.bf16.mxu0 %v1550_v3 }
 0x37b   : > { %1388 = vmatprep.subr.bf16.mxu1 %v1550_v3 }
 0x37c   : > { %1373 = vmatmul.mubr.msk.bf16.vlgmr.msra.gmra.mrb[16].mxu0 %vm612_vm6, %v826_v36 }
 0x37d   : > { %1384 = vmatprep.mubr.msk.bf16.mxu0 %vm1551_vm0, %v1550_v3 }
 0x380   : > { %1379 = vmatmul.mubr.msk.bf16.vlgmr.msra.gmra.mrb[16].mxu1 %vm612_vm6, %v1283_v37 }
 0x381   : > { %1390 = vmatprep.mubr.msk.bf16.mxu1 %vm1551_vm0, %v1550_v3 }
 0x387   : > { %v992_v50 = vpop.permute.xlu0 %991 }
 0x44b   : > { %v880_v38 = vpop.f32.mrb[12].mxu1 }
 0x44c   : > { %v1368_v39 = vpop.f32.mrb[13].mxu1 }
 0x44d   : > { %v883_v40 = vpop.f32.mrb[14].mxu1 }
 0x44e   : > { %v1369_v41 = vpop.f32.mrb[15].mxu1 }
 0x44f   : > { %v932_v42 = vpop.f32.mrb[16].mxu0 }
 0x450   : > { %v933_v43 = vadd.f32 %v932_v42, %v880_v38  ;;  %v1374_v44 = vpop.f32.mrb[17].mxu0 }
 0x451   : > { %v935_v45 = vpop.f32.mrb[18].mxu0 }
 0x452   : > { %v1375_v46 = vpop.f32.mrb[19].mxu0 }
 0x453   : > { %v981_v47 = vpop.f32.mrb[16].mxu1 }
 0x454   : > { %v987_v48 = vadd.f32 %v981_v47, %v933_v43  ;;  %v1380_v49 = vpop.f32.mrb[17].mxu1 }
 0x455   : > { %v984_v51 = vpop.f32.mrb[18].mxu1 }
 0x456   : > { %v994_v52 = vadd.f32 %v992_v50, %v987_v48  ;;  %v1381_v53 = vpop.f32.mrb[19].mxu1 }
 0x458   : > { %v995_v54 = vmax.f32 %v994_v52, 0.0 }
 0x45a   : > { %v996_v55 = vpack.c.bf16 %v995_v54, %v995_v54 }
 0x45c   : > { %997 = vst [vmem:[#allocation5 + $0x4] sm:$0xf] %v996_v55 }
 0x463   : > { %v999_v56 = vld [vmem:[#allocation5] sm:$0xff] }
 0x464   : > { %v1287_v57 = vcombine.high %v999_v56, %v999_v56  ;;  %v1286_v58 = vcombine.low %v999_v56, %v999_v56  ;;  %v1111_v1 = vld [vmem:[#allocation5 + $0x4] sm:$0xf] }
 0x465   : > { %v1116_v7 = vsel %vm616_vm5, %v1111_v1, 0 }
 0x466   : > { %1009 = vrot.lane.b32.xlu0 %v1287_v57, %s1552_s23  ;;  %1007 = vrot.lane.b32.xlu1 %v1286_v58, %s1552_s23 }
 0x46a   : > { %1060 = vrot.lane.b32.xlu0 %v1287_v57, %s1554_s15  ;;  %1058 = vrot.lane.b32.xlu1 %v1286_v58, %s1554_s15 }
 0x46e   : > { %1162 = vperm.xlu1 %1462, %v1159_v59  }
 0x4d8   : > { %v1010_v60 = vpop.permute.xlu0 %1009  ;;  %v1008_v61 = vpop.permute.xlu1 %1007 }
 0x4d9   : > { %v1011_v62 = vsel %vm490_vm2, %v1008_v61, %v1010_v60 }
 0x4da   : > { %v1016_v63 = vsel %vm616_vm5, %v1011_v62, 0 }
 0x4db   : > { %1383 = vmatpush3.bf16.msra.mxu0 %v1016_v63 }
 0x4dc   : > { %v1061_v2 = vpop.permute.xlu0 %1060  ;;  %v1059_v4 = vpop.permute.xlu1 %1058  ;;  %1394 = vmatprep.subr.bf16.mxu0 %v1550_v3 }
 0x4dd   : > { %v1062_v5 = vsel %vm438_vm4, %v1059_v4, %v1061_v2 }
 0x4de   : > { %v1067_v6 = vsel %vm616_vm5, %v1062_v5, 0  ;;  %1385 = vmatmul.mubr.msk.bf16.vlgmr.msra.gmra.mrb[20].mxu0 %vm612_vm6, %v1285_v0 }
 0x4df   : > { %1389 = vmatpush3.bf16.msra.mxu1 %v1067_v6  ;;  %1395 = vmatpush3.bf16.msra.mxu0 %v1116_v7 }
 0x4e0   : > { %1396 = vmatprep.mubr.msk.bf16.mxu0 %vm1551_vm0, %v1550_v3 }
 0x4e2   : > { %1391 = vmatmul.mubr.msk.bf16.vlgmr.msra.gmra.mrb[20].mxu1 %vm612_vm6, %v998_v8 }
 0x4e6   : > { %1397 = vmatmul.mubr.msk.bf16.vlgmr.msra.gmra.mrb[24].mxu0 %vm612_vm6, %v1290_v9 }
 0x4ed   : > { %v1163_v22 = vpop.permute.xlu1 %1162 }
 0x5b1   : > { %v1052_v10 = vpop.f32.mrb[20].mxu0 }
 0x5b2   : > { %v1386_v11 = vpop.f32.mrb[21].mxu0 }
 0x5b3   : > { %v1055_v12 = vpop.f32.mrb[22].mxu0 }
 0x5b4   : > { %v1387_v13 = vpop.f32.mrb[23].mxu0 }
 0x5b5   : > { %v1103_v14 = vpop.f32.mrb[20].mxu1 }
 0x5b6   : > { %v1104_v15 = vadd.f32 %v1103_v14, %v1052_v10  ;;  %v1392_v16 = vpop.f32.mrb[21].mxu1 }
 0x5b7   : > { %v1106_v17 = vpop.f32.mrb[22].mxu1 }
 0x5b8   : > { %v1393_v18 = vpop.f32.mrb[23].mxu1 }
 0x5b9   : > { %v1152_v3 = vpop.f32.mrb[24].mxu0 }
 0x5ba   : > { %v1158_v19 = vadd.f32 %v1152_v3, %v1104_v15  ;;  %v1398_v21 = vpop.f32.mrb[25].mxu0 }
 0x5bb   : > { %v1155_v23 = vpop.f32.mrb[26].mxu0 }
 0x5bc   : > { %v1165_v24 = vadd.f32 %v1163_v22, %v1158_v19  ;;  %v1399_v25 = vpop.f32.mrb[27].mxu0 }
 0x5be   : > { %v1166_v27 = vmax.f32 %v1165_v24, 0.0 }
 0x5c0   : > { %v1168_v28 = vadd.f32 %v1167_v26, %v1166_v27 }
 0x5c2   : > { %v1169_v29 = vmax.f32 %v1168_v28, 0.0 }
 0x5c4   : > { %1170 = vst [vmem:[%s399_s28] sm:$0xff] %v1169_v29 }
 0x5c5   : > { %1482 = shalt.err (!%p1479_p5)
}
 0x5c6   : > { %s1483_s16 = scalar_lea.hbm %s1832_s13, 128  ;;  %s1487_s23 = scalar_lea.hbm %s1890_s11, 256 }
 0x5c7   : > { %p1484_p6 = scmp.ne.s32.totalorder %s1832_s13, %s1483_s16  ;;  %p1488_p10 = scmp.lt.u32.totalorder %s1832_s13, %s1890_s11 }
 0x5c8   : > { %p1489_p11 = scmp.lt.u32.totalorder %s1487_s23, %s1483_s16  ;;  %p1491_p13 = scmp.lt.u32.totalorder %s1483_s16, %s1832_s13 }
 0x5c9   : > { %p1485_p7 = pnand %p1484_p6, %p1656_p4 }
 0x5ca   : > { %p1490_p12 = por %p1489_p11, %p1488_p10 }
 0x5cb   : > { %p1486_p9 = pneg %p1485_p7 }
 0x5cc   : > { %p1492_p0 = por %p1491_p13, %p1490_p12 }
 0x5ce   : > { %p1493_p1 = pnand %p1492_p0, %p1486_p9 }
 0x5d0   : > { %1496 = shalt.err (!%p1493_p1)
}
 0x5d1   : > { %1400 = dma.vmem_to_hbm [thread:$0]  (%p1656_p4), %s1834_s12, 128, %s1832_s13, %s1172_s14  }
 0x5d2 PF: > { %p1406_p2 = scmp.ge.s32.totalorder %s1547_s22, 2  ;;  %s1198_s0 = sand.u32 1, %s1527_s17  }
 0x5d3   : > { %s1199_s1 = scalar_lea.sflag [#allocation7], %s1198_s0 }
 0x5d4   : > { %p1403_p3 = pnand %p1406_p2, %p1663_p8 }
 0x5d6   : > { %1522 = dma.done.wait (!%p1403_p3), %s1199_s1, 128  }
 0x5d7   : > { %1524 = vsyncadd (!%p1403_p3), %s1199_s1, 4294967168  ;;  %s24_s22 = sadd.s32 1, %s1547_s22   ;;  %s1897_s17 = smov %s1531_s18 }
 0x5d8   : > { %p21_p5 = scmp.ge.s32.totalorder %s24_s22, 4   ;;  %s1898_s18 = smov %s1535_s19 }
 0x5d9   : > { %s1899_s19 = smov %s1669_s30  ;;  %s1900_s20 = smov %s1543_s21 }
 0x5da   : > { %s1901_s21 = smov %s1903_s25  ;;  %23 = sbr.rel (!%p21_p5) target bundleno = 7 (0x7), region = 111 }
 0x5e1   :  { %1204 = vsyncpa [#allocation7], 1 }
 0x5e2   :  { %1206 = vsyncpa [#allocation7 + $0x1], 1 }

</bundles_post_ra>
